<compile_context>
chip_gen: v7x
topology: tpu7x:2x2x1
jax: 0.10.0
libtpu: 0.0.40
codegen_flags: <defaults>
</compile_context>

<pallas_src>
import functools

import jax
import jax.numpy as jnp
from jax import lax
from jax.experimental import pallas as pl
from jax.experimental.pallas import tpu as pltpu

EPS = 1e-12  # F.normalize eps


def _vmem_spec():
    return pl.BlockSpec(memory_space=pltpu.MemorySpace.VMEM)


def _smem_spec():
    return pl.BlockSpec(memory_space=pltpu.MemorySpace.SMEM)


def _row_normalize(x):
    # F.normalize(p=2, dim=1, eps=1e-12): x / max(||x||, eps) == x * rsqrt(max(ss, eps^2))
    ss = jnp.sum(x * x, axis=1, keepdims=True)
    return x * lax.rsqrt(jnp.maximum(ss, EPS * EPS))


# ---------------------------------------------------------------------------
# Fused kernel: attention x2 -> projection (batched) -> transformation ->
# losses -> bank similarity, all VMEM/vreg-resident.
# ---------------------------------------------------------------------------
def _fused_kernel(xv_ref, xp_ref, w_ref,
                  vp_ref, sp_ref, pred_ref, bank_ref, vattn_ref, sattn_ref,
                  loss_ref, *, margin, k, th, off):
    f32 = jnp.float32

    def W(name):
        # static, 8-row-aligned slice of the packed weight slab (no relayout).
        r0, nr, nc = off[name]
        return w_ref[r0:r0 + nr, 0:nc].astype(f32)

    xv = xv_ref[...].astype(f32)          # [Nv, H]
    xp = xp_ref[...].astype(f32)          # [Np, H]
    pv = W("vuln_patterns")               # [K, H] learnable vuln pattern bank
    ps = W("sec_patterns")                # [K, H] learnable security pattern bank

    def _attention(p, x):
        # scores [K, N]: node axis on lanes -> softmax reduces along lanes.
        scores = lax.dot_general(p, x, (((1,), (1,)), ((), ())),
                                 preferred_element_type=f32)
        m = jnp.max(scores, axis=-1, keepdims=True)
        e = jnp.exp(scores - m)
        denom = jnp.sum(e, axis=-1, keepdims=True)
        attn = e * pl.reciprocal(denom, approx=True)           # EUP, off VALU path
        emb = jnp.dot(attn, x, preferred_element_type=f32)     # [K, H]
        return emb, attn

    emb_v, attn_v = _attention(pv, xv)
    emb_s, attn_s = _attention(ps, xp)
    # module interface wants [num_nodes, num_patterns]: one in-kernel vxpose.
    vattn_ref[...] = attn_v.T                                  # [Nv, K]
    sattn_ref[...] = attn_s.T                                  # [Np, K]

    # ---- pattern_projection (shared weights) batched over stacked [2K, H] ----
    emb = jnp.concatenate([emb_v, emb_s], axis=0)              # [2K, H] (sublane stack)
    h = jnp.dot(emb, W("proj_w1"), preferred_element_type=f32) + W("proj_b1")
    h = jnp.maximum(h, 0.0)                                    # Dropout = identity (eval)
    proj = jnp.dot(h, W("proj_w2"), preferred_element_type=f32) + W("proj_b2")
    vp = proj[:k]                                              # [K, Pd]
    sp = proj[k:]                                              # [K, Pd]

    # ---- transformation_net on concat([vp, broadcast(mean(vp))], -1) ----
    # fused first layer: AB = vp @ [W1a | W1b]; h1 = A + mean_rows(B) + b1
    ab = jnp.dot(vp, W("tr_w1ab"), preferred_element_type=f32)  # [K, 2*TH]
    h1 = ab[:, :th] + jnp.mean(ab[:, th:], axis=0, keepdims=True) + W("tr_b1")
    h1 = jnp.maximum(h1, 0.0)
    h2 = jnp.dot(h1, W("tr_w2"), preferred_element_type=f32) + W("tr_b2")
    h2 = jnp.maximum(h2, 0.0)
    pred = jnp.dot(h2, W("tr_w3"), preferred_element_type=f32) + W("tr_b3")

    vp_ref[...] = vp
    sp_ref[...] = sp
    pred_ref[...] = pred

    # ---- reconstruction loss: MSE(predicted_security, security) ----
    recon = jnp.mean((pred - sp) ** 2)

    # ---- contrastive loss (equal-size branch; matches torch reductions) ----
    vn = _row_normalize(vp)
    sn = _row_normalize(sp)
    sim = lax.dot_general(vn, sn, (((1,), (1,)), ((), ())),
                          preferred_element_type=f32)          # [K, K]
    ri = lax.broadcasted_iota(jnp.int32, (k, k), 0)
    ci = lax.broadcasted_iota(jnp.int32, (k, k), 1)
    eye = (ri == ci).astype(f32)
    pos = jnp.mean((sim * eye - eye) ** 2)                     # F.mse_loss over K*K
    neg_mask = 1.0 - eye
    neg = jnp.mean(jnp.maximum(sim * neg_mask - margin, 0.0) * neg_mask)

    loss_ref[0] = pos + neg
    loss_ref[1] = recon

    # ---- pattern similarity between the raw learnable banks ----
    bvn = _row_normalize(pv)
    bsn = _row_normalize(ps)
    bank_ref[...] = lax.dot_general(bvn, bsn, (((1,), (1,)), ((), ())),
                                    preferred_element_type=f32)  # [K, K]


# ---------------------------------------------------------------------------
# Parameters (packed into a single constant slab at init time)
# ---------------------------------------------------------------------------
def _pack_weights(pieces, lane_width):
    """Stack pieces along the sublane axis, each padded to a multiple of 8 rows."""
    offsets = {}
    blocks = []
    row = 0
    for name, a in pieces:
        r, c = a.shape
        rp = -(-r // 8) * 8
        blk = jnp.zeros((rp, lane_width), jnp.float32).at[:r, :c].set(a)
        blocks.append(blk)
        offsets[name] = (row, r, c)
        row += rp
    return jnp.concatenate(blocks, axis=0), offsets


def init_params(key, hidden_dim, pattern_dim, num_patterns, trans_hidden):
    ks = jax.random.split(key, 8)

    def lin(kw, fan_in, fan_out):
        w = jax.random.normal(kw, (fan_in, fan_out), jnp.float32) / jnp.sqrt(fan_in)
        b = jnp.zeros((1, fan_out), jnp.float32)
        return w, b

    vuln_patterns = jax.random.normal(ks[0], (num_patterns, hidden_dim), jnp.float32)
    sec_patterns = jax.random.normal(ks[1], (num_patterns, hidden_dim), jnp.float32)
    proj_w1, proj_b1 = lin(ks[2], hidden_dim, pattern_dim)
    proj_w2, proj_b2 = lin(ks[3], pattern_dim, pattern_dim)
    tr_w1, tr_b1 = lin(ks[4], 2 * pattern_dim, trans_hidden)
    # fuse transformation_net first layer once at init:
    # concat([x, mean(x)]) @ W1 == split of x @ [W1[:Pd] | W1[Pd:]]  (by linearity)
    tr_w1ab = jnp.concatenate([tr_w1[:pattern_dim, :], tr_w1[pattern_dim:, :]], axis=1)
    tr_w2, tr_b2 = lin(ks[5], trans_hidden, trans_hidden)
    tr_w3, tr_b3 = lin(ks[6], trans_hidden, pattern_dim)

    pieces = [
        ("vuln_patterns", vuln_patterns),
        ("sec_patterns", sec_patterns),
        ("proj_w1", proj_w1), ("proj_b1", proj_b1),
        ("proj_w2", proj_w2), ("proj_b2", proj_b2),
        ("tr_w1ab", tr_w1ab), ("tr_b1", tr_b1),
        ("tr_w2", tr_w2), ("tr_b2", tr_b2),
        ("tr_w3", tr_w3), ("tr_b3", tr_b3),
    ]
    lane_width = max(a.shape[1] for _, a in pieces)   # <= 128
    slab, off = _pack_weights(pieces, lane_width)
    return {
        "w_slab": slab,           # single VMEM input for all weights/biases
        "w_off": off,             # static (row, rows, cols) per piece
        "dims": {"hidden_dim": hidden_dim, "pattern_dim": pattern_dim,
                 "num_patterns": num_patterns, "trans_hidden": trans_hidden},
    }


# ---------------------------------------------------------------------------
# Forward
# ---------------------------------------------------------------------------
def pattern_learning_forward(params, vuln_embeddings, patch_embeddings, margin):
    if "vuln" in vuln_embeddings and "patch" in patch_embeddings:
        x_vuln = vuln_embeddings["vuln"]
        x_patch = patch_embeddings["patch"]
    else:
        node_type = "code" if "code" in vuln_embeddings else list(vuln_embeddings)[0]
        x_vuln = vuln_embeddings[node_type]
        x_patch = patch_embeddings[node_type]

    dims = params["dims"]
    k = dims["num_patterns"]
    pd = dims["pattern_dim"]
    th = dims["trans_hidden"]
    nv = x_vuln.shape[0]
    np_ = x_patch.shape[0]

    kern = functools.partial(_fused_kernel, margin=float(margin), k=k, th=th,
                             off=params["w_off"])

    vp, sp, pred, bank_sim, vattn, sattn, losses = pl.pallas_call(
        kern,
        out_shape=(
            jax.ShapeDtypeStruct((k, pd), jnp.float32),   # vuln_patterns
            jax.ShapeDtypeStruct((k, pd), jnp.float32),   # security_patterns
            jax.ShapeDtypeStruct((k, pd), jnp.float32),   # predicted_security
            jax.ShapeDtypeStruct((k, k), jnp.float32),    # bank similarity
            jax.ShapeDtypeStruct((nv, k), jnp.float32),   # vuln attention [N, K]
            jax.ShapeDtypeStruct((np_, k), jnp.float32),  # sec attention [N, K]
            jax.ShapeDtypeStruct((2,), jnp.float32),      # [contrastive, recon]
        ),
        in_specs=[_vmem_spec(), _vmem_spec(), _vmem_spec()],
        out_specs=(_vmem_spec(), _vmem_spec(), _vmem_spec(), _vmem_spec(),
                   _vmem_spec(), _vmem_spec(), _smem_spec()),
    )(x_vuln, x_patch, params["w_slab"])

    contrastive_loss = losses[0]
    reconstruction_loss = losses[1]

    pattern_outputs = {
        "vuln_patterns": vp,
        "security_patterns": sp,
        "predicted_security_patterns": pred,
        "vuln_attention": vattn,
        "security_attention": sattn,
    }
    return contrastive_loss, reconstruction_loss, bank_sim, pattern_outputs


# ---------------------------------------------------------------------------
if __name__ == "__main__":
    # config (small, consistent with the module's __init__)
    hidden_dim = 32
    pattern_dim = 16
    num_patterns = 8
    trans_hidden = 32
    contrastive_margin = 0.5
    n_vuln_nodes = 16
    n_patch_nodes = 16

    key = jax.random.PRNGKey(0)
    k_param, k_v, k_p = jax.random.split(key, 3)

    params = init_params(k_param, hidden_dim, pattern_dim, num_patterns, trans_hidden)

    vuln_embeddings = {"vuln": jax.random.normal(
        k_v, (n_vuln_nodes, hidden_dim), jnp.float32)}
    patch_embeddings = {"patch": jax.random.normal(
        k_p, (n_patch_nodes, hidden_dim), jnp.float32)}

    cl, rl, sim, outs = pattern_learning_forward(
        params, vuln_embeddings, patch_embeddings, contrastive_margin)

    jax.block_until_ready((cl, rl, sim, outs))

    assert sim.shape == (num_patterns, num_patterns)
    assert outs["vuln_patterns"].shape == (num_patterns, pattern_dim)
    assert outs["security_patterns"].shape == (num_patterns, pattern_dim)
    assert outs["predicted_security_patterns"].shape == (num_patterns, pattern_dim)
    assert outs["vuln_attention"].shape == (n_vuln_nodes, num_patterns)
    assert outs["security_attention"].shape == (n_patch_nodes, num_patterns)
    assert bool(jnp.isfinite(cl)) and bool(jnp.isfinite(rl))
    print("KERNEL_OK")
</pallas_src>

<mosaic_0001>
module attributes {stable_mosaic.version = 11 : i64} {
  func.func @_fused_kernel(%arg0: memref<16x32xf32, #tpu.memory_space<vmem>>, %arg1: memref<16x32xf32, #tpu.memory_space<vmem>>, %arg2: memref<184x64xf32, #tpu.memory_space<vmem>>, %arg3: memref<8x16xf32, #tpu.memory_space<vmem>>, %arg4: memref<8x16xf32, #tpu.memory_space<vmem>>, %arg5: memref<8x16xf32, #tpu.memory_space<vmem>>, %arg6: memref<8x8xf32, #tpu.memory_space<vmem>>, %arg7: memref<16x8xf32, #tpu.memory_space<vmem>>, %arg8: memref<16x8xf32, #tpu.memory_space<vmem>>, %arg9: memref<2xf32, #tpu.memory_space<smem>>) attributes {dimension_semantics = [], scalar_prefetch = 0 : i64, scratch_operands = 0 : i64, tpu.core_type = #tpu.core_type<tc>} {
    %c0 = arith.constant 0 : index
    %c0_0 = arith.constant 0 : index
    %0 = vector.load %arg0[%c0, %c0_0] : memref<16x32xf32, #tpu.memory_space<vmem>>, vector<16x32xf32>
    %c0_1 = arith.constant 0 : index
    %c0_2 = arith.constant 0 : index
    %1 = vector.load %arg1[%c0_1, %c0_2] : memref<16x32xf32, #tpu.memory_space<vmem>>, vector<16x32xf32>
    %c0_3 = arith.constant 0 : index
    %c0_4 = arith.constant 0 : index
    %2 = vector.load %arg2[%c0_3, %c0_4] : memref<184x64xf32, #tpu.memory_space<vmem>>, vector<8x32xf32>
    %c8 = arith.constant 8 : index
    %c0_5 = arith.constant 0 : index
    %3 = vector.load %arg2[%c8, %c0_5] : memref<184x64xf32, #tpu.memory_space<vmem>>, vector<8x32xf32>
    %cst = arith.constant dense<0.000000e+00> : vector<8x16xf32>
    %4 = tpu.matmul %2, %0, %cst {dimension_numbers = #tpu.dot_dimension_numbers<[1], [1], [0], [0], [0, 0, 1, 0], [], []>} : vector<8x32xf32>, vector<16x32xf32>, vector<8x16xf32> -> vector<8x16xf32>
    %cst_6 = arith.constant dense<0xFF800000> : vector<8xf32>
    %5 = vector.multi_reduction <maximumf>, %4, %cst_6 [1] : vector<8x16xf32> to vector<8xf32>
    %6 = vector.shape_cast %5 : vector<8xf32> to vector<8x1xf32>
    %7 = vector.broadcast %6 : vector<8x1xf32> to vector<8x16xf32>
    %8 = arith.subf %4, %7 : vector<8x16xf32>
    %9 = math.exp %8 : vector<8x16xf32>
    %cst_7 = arith.constant dense<0.000000e+00> : vector<8xf32>
    %10 = vector.multi_reduction <add>, %9, %cst_7 [1] : vector<8x16xf32> to vector<8xf32>
    %11 = vector.shape_cast %10 : vector<8xf32> to vector<8x1xf32>
    %12 = tpu.reciprocal %11 {approx = true} : vector<8x1xf32> -> vector<8x1xf32>
    %13 = vector.broadcast %12 : vector<8x1xf32> to vector<8x16xf32>
    %14 = arith.mulf %9, %13 : vector<8x16xf32>
    %cst_8 = arith.constant dense<0.000000e+00> : vector<8x32xf32>
    %15 = tpu.matmul %14, %0, %cst_8 {dimension_numbers = #tpu.dot_dimension_numbers<[1], [0], [0], [1], [0, 0, 1, 1], [], []>} : vector<8x16xf32>, vector<16x32xf32>, vector<8x32xf32> -> vector<8x32xf32>
    %cst_9 = arith.constant dense<0.000000e+00> : vector<8x16xf32>
    %16 = tpu.matmul %3, %1, %cst_9 {dimension_numbers = #tpu.dot_dimension_numbers<[1], [1], [0], [0], [0, 0, 1, 0], [], []>} : vector<8x32xf32>, vector<16x32xf32>, vector<8x16xf32> -> vector<8x16xf32>
    %cst_10 = arith.constant dense<0xFF800000> : vector<8xf32>
    %17 = vector.multi_reduction <maximumf>, %16, %cst_10 [1] : vector<8x16xf32> to vector<8xf32>
    %18 = vector.shape_cast %17 : vector<8xf32> to vector<8x1xf32>
    %19 = vector.broadcast %18 : vector<8x1xf32> to vector<8x16xf32>
    %20 = arith.subf %16, %19 : vector<8x16xf32>
    %21 = math.exp %20 : vector<8x16xf32>
    %cst_11 = arith.constant dense<0.000000e+00> : vector<8xf32>
    %22 = vector.multi_reduction <add>, %21, %cst_11 [1] : vector<8x16xf32> to vector<8xf32>
    %23 = vector.shape_cast %22 : vector<8xf32> to vector<8x1xf32>
    %24 = tpu.reciprocal %23 {approx = true} : vector<8x1xf32> -> vector<8x1xf32>
    %25 = vector.broadcast %24 : vector<8x1xf32> to vector<8x16xf32>
    %26 = arith.mulf %21, %25 : vector<8x16xf32>
    %cst_12 = arith.constant dense<0.000000e+00> : vector<8x32xf32>
    %27 = tpu.matmul %26, %1, %cst_12 {dimension_numbers = #tpu.dot_dimension_numbers<[1], [0], [0], [1], [0, 0, 1, 1], [], []>} : vector<8x16xf32>, vector<16x32xf32>, vector<8x32xf32> -> vector<8x32xf32>
    %28 = tpu.transpose %14, [1, 0] : vector<8x16xf32> -> vector<16x8xf32>
    %c0_13 = arith.constant 0 : index
    %c0_14 = arith.constant 0 : index
    %29 = vector.load %arg7[%c0_13, %c0_14] : memref<16x8xf32, #tpu.memory_space<vmem>>, vector<16x8xf32>
    tpu.vector_store %arg7[%c0_13, %c0_14], %28 {strides = array<i32>} : memref<16x8xf32, #tpu.memory_space<vmem>>, vector<16x8xf32>,
    %30 = tpu.transpose %26, [1, 0] : vector<8x16xf32> -> vector<16x8xf32>
    %c0_15 = arith.constant 0 : index
    %c0_16 = arith.constant 0 : index
    %31 = vector.load %arg8[%c0_15, %c0_16] : memref<16x8xf32, #tpu.memory_space<vmem>>, vector<16x8xf32>
    tpu.vector_store %arg8[%c0_15, %c0_16], %30 {strides = array<i32>} : memref<16x8xf32, #tpu.memory_space<vmem>>, vector<16x8xf32>,
    %32 = tpu.concatenate %15, %27 in 0 : vector<8x32xf32>, vector<8x32xf32> -> vector<16x32xf32>
    %c16 = arith.constant 16 : index
    %c0_17 = arith.constant 0 : index
    %33 = vector.load %arg2[%c16, %c0_17] : memref<184x64xf32, #tpu.memory_space<vmem>>, vector<32x16xf32>
    %cst_18 = arith.constant dense<0.000000e+00> : vector<16x16xf32>
    %34 = tpu.matmul %32, %33, %cst_18 {dimension_numbers = #tpu.dot_dimension_numbers<[1], [0], [0], [1], [0, 0, 1, 1], [], []>} : vector<16x32xf32>, vector<32x16xf32>, vector<16x16xf32> -> vector<16x16xf32>
    %c48 = arith.constant 48 : index
    %c0_19 = arith.constant 0 : index
    %35 = vector.load %arg2[%c48, %c0_19] : memref<184x64xf32, #tpu.memory_space<vmem>>, vector<1x16xf32>
    %36 = vector.broadcast %35 : vector<1x16xf32> to vector<16x16xf32>
    %37 = arith.addf %34, %36 : vector<16x16xf32>
    %cst_20 = arith.constant 0.000000e+00 : f32
    %38 = vector.broadcast %cst_20 : f32 to vector<16x16xf32>
    %39 = arith.maximumf %37, %38 : vector<16x16xf32>
    %c56 = arith.constant 56 : index
    %c0_21 = arith.constant 0 : index
    %40 = vector.load %arg2[%c56, %c0_21] : memref<184x64xf32, #tpu.memory_space<vmem>>, vector<16x16xf32>
    %cst_22 = arith.constant dense<0.000000e+00> : vector<16x16xf32>
    %41 = tpu.matmul %39, %40, %cst_22 {dimension_numbers = #tpu.dot_dimension_numbers<[1], [0], [0], [1], [0, 0, 1, 1], [], []>} : vector<16x16xf32>, vector<16x16xf32>, vector<16x16xf32> -> vector<16x16xf32>
    %c72 = arith.constant 72 : index
    %c0_23 = arith.constant 0 : index
    %42 = vector.load %arg2[%c72, %c0_23] : memref<184x64xf32, #tpu.memory_space<vmem>>, vector<1x16xf32>
    %43 = vector.broadcast %42 : vector<1x16xf32> to vector<16x16xf32>
    %44 = arith.addf %41, %43 : vector<16x16xf32>
    %45 = vector.extract_strided_slice %44 {offsets = [0, 0], sizes = [8, 16], strides = [1, 1]} : vector<16x16xf32> to vector<8x16xf32>
    %46 = vector.extract_strided_slice %44 {offsets = [8, 0], sizes = [8, 16], strides = [1, 1]} : vector<16x16xf32> to vector<8x16xf32>
    %c80 = arith.constant 80 : index
    %c0_24 = arith.constant 0 : index
    %47 = vector.load %arg2[%c80, %c0_24] : memref<184x64xf32, #tpu.memory_space<vmem>>, vector<16x64xf32>
    %cst_25 = arith.constant dense<0.000000e+00> : vector<8x64xf32>
    %48 = tpu.matmul %45, %47, %cst_25 {dimension_numbers = #tpu.dot_dimension_numbers<[1], [0], [0], [1], [0, 0, 1, 1], [], []>} : vector<8x16xf32>, vector<16x64xf32>, vector<8x64xf32> -> vector<8x64xf32>
    %49 = vector.extract_strided_slice %48 {offsets = [0, 0], sizes = [8, 32], strides = [1, 1]} : vector<8x64xf32> to vector<8x32xf32>
    %50 = vector.extract_strided_slice %48 {offsets = [0, 32], sizes = [8, 32], strides = [1, 1]} : vector<8x64xf32> to vector<8x32xf32>
    %cst_26 = arith.constant dense<0.000000e+00> : vector<32xf32>
    %51 = vector.multi_reduction <add>, %50, %cst_26 [0] : vector<8x32xf32> to vector<32xf32>
    %52 = vector.shape_cast %51 : vector<32xf32> to vector<1x32xf32>
    %cst_27 = arith.constant 8.000000e+00 : f32
    %53 = vector.broadcast %cst_27 : f32 to vector<1x32xf32>
    %54 = arith.divf %52, %53 : vector<1x32xf32>
    %55 = vector.broadcast %54 : vector<1x32xf32> to vector<8x32xf32>
    %56 = arith.addf %49, %55 : vector<8x32xf32>
    %c96 = arith.constant 96 : index
    %c0_28 = arith.constant 0 : index
    %57 = vector.load %arg2[%c96, %c0_28] : memref<184x64xf32, #tpu.memory_space<vmem>>, vector<1x32xf32>
    %58 = vector.broadcast %57 : vector<1x32xf32> to vector<8x32xf32>
    %59 = arith.addf %56, %58 : vector<8x32xf32>
    %cst_29 = arith.constant 0.000000e+00 : f32
    %60 = vector.broadcast %cst_29 : f32 to vector<8x32xf32>
    %61 = arith.maximumf %59, %60 : vector<8x32xf32>
    %c104 = arith.constant 104 : index
    %c0_30 = arith.constant 0 : index
    %62 = vector.load %arg2[%c104, %c0_30] : memref<184x64xf32, #tpu.memory_space<vmem>>, vector<32x32xf32>
    %cst_31 = arith.constant dense<0.000000e+00> : vector<8x32xf32>
    %63 = tpu.matmul %61, %62, %cst_31 {dimension_numbers = #tpu.dot_dimension_numbers<[1], [0], [0], [1], [0, 0, 1, 1], [], []>} : vector<8x32xf32>, vector<32x32xf32>, vector<8x32xf32> -> vector<8x32xf32>
    %c136 = arith.constant 136 : index
    %c0_32 = arith.constant 0 : index
    %64 = vector.load %arg2[%c136, %c0_32] : memref<184x64xf32, #tpu.memory_space<vmem>>, vector<1x32xf32>
    %65 = vector.broadcast %64 : vector<1x32xf32> to vector<8x32xf32>
    %66 = arith.addf %63, %65 : vector<8x32xf32>
    %cst_33 = arith.constant 0.000000e+00 : f32
    %67 = vector.broadcast %cst_33 : f32 to vector<8x32xf32>
    %68 = arith.maximumf %66, %67 : vector<8x32xf32>
    %c144 = arith.constant 144 : index
    %c0_34 = arith.constant 0 : index
    %69 = vector.load %arg2[%c144, %c0_34] : memref<184x64xf32, #tpu.memory_space<vmem>>, vector<32x16xf32>
    %cst_35 = arith.constant dense<0.000000e+00> : vector<8x16xf32>
    %70 = tpu.matmul %68, %69, %cst_35 {dimension_numbers = #tpu.dot_dimension_numbers<[1], [0], [0], [1], [0, 0, 1, 1], [], []>} : vector<8x32xf32>, vector<32x16xf32>, vector<8x16xf32> -> vector<8x16xf32>
    %c176 = arith.constant 176 : index
    %c0_36 = arith.constant 0 : index
    %71 = vector.load %arg2[%c176, %c0_36] : memref<184x64xf32, #tpu.memory_space<vmem>>, vector<1x16xf32>
    %72 = vector.broadcast %71 : vector<1x16xf32> to vector<8x16xf32>
    %73 = arith.addf %70, %72 : vector<8x16xf32>
    %c0_37 = arith.constant 0 : index
    %c0_38 = arith.constant 0 : index
    %74 = vector.load %arg3[%c0_37, %c0_38] : memref<8x16xf32, #tpu.memory_space<vmem>>, vector<8x16xf32>
    tpu.vector_store %arg3[%c0_37, %c0_38], %45 {strides = array<i32>} : memref<8x16xf32, #tpu.memory_space<vmem>>, vector<8x16xf32>,
    %c0_39 = arith.constant 0 : index
    %c0_40 = arith.constant 0 : index
    %75 = vector.load %arg4[%c0_39, %c0_40] : memref<8x16xf32, #tpu.memory_space<vmem>>, vector<8x16xf32>
    tpu.vector_store %arg4[%c0_39, %c0_40], %46 {strides = array<i32>} : memref<8x16xf32, #tpu.memory_space<vmem>>, vector<8x16xf32>,
    %c0_41 = arith.constant 0 : index
    %c0_42 = arith.constant 0 : index
    %76 = vector.load %arg5[%c0_41, %c0_42] : memref<8x16xf32, #tpu.memory_space<vmem>>, vector<8x16xf32>
    tpu.vector_store %arg5[%c0_41, %c0_42], %73 {strides = array<i32>} : memref<8x16xf32, #tpu.memory_space<vmem>>, vector<8x16xf32>,
    %77 = arith.subf %73, %46 : vector<8x16xf32>
    %78 = arith.mulf %77, %77 : vector<8x16xf32>
    %79 = vector.shape_cast %78 : vector<8x16xf32> to vector<1x8x16xf32>
    %cst_43 = arith.constant dense<0.000000e+00> : vector<1xf32>
    %80 = vector.multi_reduction <add>, %79, %cst_43 [1, 2] : vector<1x8x16xf32> to vector<1xf32>
    %81 = vector.shape_cast %80 : vector<1xf32> to vector<1x1x1xf32>
    %82 = vector.extract %81[0, 0, 0] : f32 from vector<1x1x1xf32>
    %cst_44 = arith.constant 1.280000e+02 : f32
    %83 = arith.divf %82, %cst_44 : f32
    %84 = arith.mulf %45, %45 : vector<8x16xf32>
    %cst_45 = arith.constant dense<0.000000e+00> : vector<8xf32>
    %85 = vector.multi_reduction <add>, %84, %cst_45 [1] : vector<8x16xf32> to vector<8xf32>
    %86 = vector.shape_cast %85 : vector<8xf32> to vector<8x1xf32>
    %cst_46 = arith.constant 1.000000e-24 : f32
    %87 = vector.broadcast %cst_46 : f32 to vector<8x1xf32>
    %88 = arith.maximumf %86, %87 : vector<8x1xf32>
    %89 = math.rsqrt %88 : vector<8x1xf32>
    %90 = vector.broadcast %89 : vector<8x1xf32> to vector<8x16xf32>
    %91 = arith.mulf %45, %90 : vector<8x16xf32>
    %92 = arith.mulf %46, %46 : vector<8x16xf32>
    %cst_47 = arith.constant dense<0.000000e+00> : vector<8xf32>
    %93 = vector.multi_reduction <add>, %92, %cst_47 [1] : vector<8x16xf32> to vector<8xf32>
    %94 = vector.shape_cast %93 : vector<8xf32> to vector<8x1xf32>
    %cst_48 = arith.constant 1.000000e-24 : f32
    %95 = vector.broadcast %cst_48 : f32 to vector<8x1xf32>
    %96 = arith.maximumf %94, %95 : vector<8x1xf32>
    %97 = math.rsqrt %96 : vector<8x1xf32>
    %98 = vector.broadcast %97 : vector<8x1xf32> to vector<8x16xf32>
    %99 = arith.mulf %46, %98 : vector<8x16xf32>
    %cst_49 = arith.constant dense<0.000000e+00> : vector<8x8xf32>
    %100 = tpu.matmul %91, %99, %cst_49 {dimension_numbers = #tpu.dot_dimension_numbers<[1], [1], [0], [0], [0, 0, 1, 0], [], []>} : vector<8x16xf32>, vector<8x16xf32>, vector<8x8xf32> -> vector<8x8xf32>
    %101 = tpu.iota {dimensions = array<i32: 0>} : vector<8x8xi32>
    %102 = tpu.iota {dimensions = array<i32: 1>} : vector<8x8xi32>
    %103 = arith.cmpi eq, %101, %102 : vector<8x8xi32>
    %104 = arith.extui %103 : vector<8x8xi1> to vector<8x8xi32>
    %105 = arith.sitofp %104 : vector<8x8xi32> to vector<8x8xf32>
    %106 = arith.mulf %100, %105 : vector<8x8xf32>
    %107 = arith.subf %106, %105 : vector<8x8xf32>
    %108 = arith.mulf %107, %107 : vector<8x8xf32>
    %109 = vector.shape_cast %108 : vector<8x8xf32> to vector<1x8x8xf32>
    %cst_50 = arith.constant dense<0.000000e+00> : vector<1xf32>
    %110 = vector.multi_reduction <add>, %109, %cst_50 [1, 2] : vector<1x8x8xf32> to vector<1xf32>
    %111 = vector.shape_cast %110 : vector<1xf32> to vector<1x1x1xf32>
    %112 = vector.extract %111[0, 0, 0] : f32 from vector<1x1x1xf32>
    %cst_51 = arith.constant 6.400000e+01 : f32
    %113 = arith.divf %112, %cst_51 : f32
    %cst_52 = arith.constant 1.000000e+00 : f32
    %114 = vector.broadcast %cst_52 : f32 to vector<8x8xf32>
    %115 = arith.subf %114, %105 : vector<8x8xf32>
    %116 = arith.mulf %100, %115 : vector<8x8xf32>
    %cst_53 = arith.constant 5.000000e-01 : f32
    %117 = vector.broadcast %cst_53 : f32 to vector<8x8xf32>
    %118 = arith.subf %116, %117 : vector<8x8xf32>
    %cst_54 = arith.constant 0.000000e+00 : f32
    %119 = vector.broadcast %cst_54 : f32 to vector<8x8xf32>
    %120 = arith.maximumf %118, %119 : vector<8x8xf32>
    %121 = arith.mulf %120, %115 : vector<8x8xf32>
    %122 = vector.shape_cast %121 : vector<8x8xf32> to vector<1x8x8xf32>
    %cst_55 = arith.constant dense<0.000000e+00> : vector<1xf32>
    %123 = vector.multi_reduction <add>, %122, %cst_55 [1, 2] : vector<1x8x8xf32> to vector<1xf32>
    %124 = vector.shape_cast %123 : vector<1xf32> to vector<1x1x1xf32>
    %125 = vector.extract %124[0, 0, 0] : f32 from vector<1x1x1xf32>
    %cst_56 = arith.constant 6.400000e+01 : f32
    %126 = arith.divf %125, %cst_56 : f32
    %127 = arith.addf %113, %126 : f32
    %c0_57 = arith.constant 0 : index
    %128 = memref.load %arg9[%c0_57] : memref<2xf32, #tpu.memory_space<smem>>
    memref.store %127, %arg9[%c0_57] : memref<2xf32, #tpu.memory_space<smem>>
    %c1 = arith.constant 1 : index
    %129 = memref.load %arg9[%c1] : memref<2xf32, #tpu.memory_space<smem>>
    memref.store %83, %arg9[%c1] : memref<2xf32, #tpu.memory_space<smem>>
    %130 = arith.mulf %2, %2 : vector<8x32xf32>
    %cst_58 = arith.constant dense<0.000000e+00> : vector<8xf32>
    %131 = vector.multi_reduction <add>, %130, %cst_58 [1] : vector<8x32xf32> to vector<8xf32>
    %132 = vector.shape_cast %131 : vector<8xf32> to vector<8x1xf32>
    %cst_59 = arith.constant 1.000000e-24 : f32
    %133 = vector.broadcast %cst_59 : f32 to vector<8x1xf32>
    %134 = arith.maximumf %132, %133 : vector<8x1xf32>
    %135 = math.rsqrt %134 : vector<8x1xf32>
    %136 = vector.broadcast %135 : vector<8x1xf32> to vector<8x32xf32>
    %137 = arith.mulf %2, %136 : vector<8x32xf32>
    %138 = arith.mulf %3, %3 : vector<8x32xf32>
    %cst_60 = arith.constant dense<0.000000e+00> : vector<8xf32>
    %139 = vector.multi_reduction <add>, %138, %cst_60 [1] : vector<8x32xf32> to vector<8xf32>
    %140 = vector.shape_cast %139 : vector<8xf32> to vector<8x1xf32>
    %cst_61 = arith.constant 1.000000e-24 : f32
    %141 = vector.broadcast %cst_61 : f32 to vector<8x1xf32>
    %142 = arith.maximumf %140, %141 : vector<8x1xf32>
    %143 = math.rsqrt %142 : vector<8x1xf32>
    %144 = vector.broadcast %143 : vector<8x1xf32> to vector<8x32xf32>
    %145 = arith.mulf %3, %144 : vector<8x32xf32>
    %cst_62 = arith.constant dense<0.000000e+00> : vector<8x8xf32>
    %146 = tpu.matmul %137, %145, %cst_62 {dimension_numbers = #tpu.dot_dimension_numbers<[1], [1], [0], [0], [0, 0, 1, 0], [], []>} : vector<8x32xf32>, vector<8x32xf32>, vector<8x8xf32> -> vector<8x8xf32>
    %c0_63 = arith.constant 0 : index
    %c0_64 = arith.constant 0 : index
    %147 = vector.load %arg6[%c0_63, %c0_64] : memref<8x8xf32, #tpu.memory_space<vmem>>, vector<8x8xf32>
    tpu.vector_store %arg6[%c0_63, %c0_64], %146 {strides = array<i32>} : memref<8x8xf32, #tpu.memory_space<vmem>>, vector<8x8xf32>,
    return
  }
}

</mosaic_0001>

<bundles_post_ra>
// kernel: tpu_custom_call.1
= control target key start
LH: loop header
LB: loop body
LE: loop exit
PB: predicated region body
PF: predicated region fallthrough
CT: control target
= control target key end

     0   :  { %15 = vsyncpa [#allocation3], 0  ;;  %s1836_s0 = inlined_call_operand.vmem [shape: f32[16,32], index: 0, kind: input, shape index: {}]   ;;  %s1837_s1 = inlined_call_operand.vmem [shape: f32[16,32], index: 1, kind: input, shape index: {}]   ;;  %s1838_s2 = inlined_call_operand.vmem [shape: f32[184,64], index: 2, kind: input, shape index: {}]   ;;  %s1839_s3 = inlined_call_operand.hbm [shape: f32[8,16], index: 3, kind: output, shape index: {0}]   ;;  %s1840_s4 = inlined_call_operand.hbm [shape: f32[8,16], index: 4, kind: output, shape index: {1}]   ;;  %s1841_s5 = inlined_call_operand.hbm [shape: f32[8,16], index: 5, kind: output, shape index: {2}]   ;;  %s1842_s6 = inlined_call_operand.hbm [shape: f32[8,8], index: 6, kind: output, shape index: {3}]   ;;  %s1843_s7 = inlined_call_operand.vmem [shape: f32[16,8], index: 7, kind: output, shape index: {4}]   ;;  %s1844_s8 = inlined_call_operand.vmem [shape: f32[16,8], index: 8, kind: output, shape index: {5}]   ;;  %s1845_s9 = inlined_call_operand.hbm [shape: f32[2], index: 9, kind: output, shape index: {6}]  }
   0x1   :  { %16 = vsyncpa [#allocation6], 0 }
   0x2   :  { %17 = vsyncpa [#allocation9], 0  ;;  %v25_v0 = vld [vmem:[%s1836_s0] sm:$0xff]  ;;  %v26_v1 = vld [vmem:[%s1836_s0 + $0x8] sm:$0xff]  ;;  %vm31_vm0 = vcmask 261120   ;;  %v1519_v2 = vmov 0.0|0.0  }
   0x3   :  { %1341 = vmatprep.subr.bf16.mxu0 %v1519_v2  ;;  %v1342_v3 = vpack.c.bf16 %v26_v1, %v25_v0  ;;  %vm1587_vm1 = vmpackc.low %vm31_vm0, %vm31_vm0  ;;  %vm1520_vm2 = vmmov 0   ;;  %v1521_v5 = vmov 0.0   ;;  %1345 = vmatprep.subr.bf16.mxu1 %v1519_v2 }
   0x4   :  { %1260 = vmatprep.mubr.msk.f32.mxu0 %vm1520_vm2, %v1521_v5  ;;  %1267 = vmatprep.mubr.msk.f32.mxu1 %vm1520_vm2, %v1521_v5 }
   0x5   :  { %18 = vsyncpa [#allocation4], 0  ;;  %1344 = vmatpush3.bf16.xpose.msk.msra.mxu0 %vm1587_vm1, %v1342_v3  ;;  %1347 = vmatpush3.bf16.msra.mxu1 %v1342_v3  ;;  %v1603_v6 = vld [vmem:[%s1838_s2] sm:$0xff]  ;;  %vm111_vm3 = vcmask 130048   ;;  %v28_v16 = vld [vmem:[%s1837_s1 + $0x8] sm:$0xff]  ;;  %vm683_vm4 = vcmask 523520  }
   0x6   :  { %1348 = vmatprep.subr.bf16.mxu1 %v1519_v2  ;;  %1352 = vmatprep.subr.bf16.mxu0 %v1519_v2  ;;  %v27_v15 = vld [vmem:[%s1837_s1] sm:$0xff]  ;;  %v1628_v21 = vld [vmem:[%s1838_s2 + $0x8] sm:$0xff]  ;;  %v428_v32 = vld [vmem:[%s1838_s2 + $0x10] sm:$0xff]  ;;  %s1522_s28 = smov 96   ;;  %vm391_vm6 = vcmask 64512   ;;  %s1523_s18 = smov [#allocation5]  }
   0x7   :  { %v1349_v17 = vpack.c.bf16 %v28_v16, %v27_v15  ;;  %v429_v33 = vld [vmem:[%s1838_s2 + $0x18] sm:$0xff]  ;;  %v430_v36 = vld [vmem:[%s1838_s2 + $0x20] sm:$0xff]  ;;  %v431_v37 = vld [vmem:[%s1838_s2 + $0x28] sm:$0xff]  ;;  %s1131_s19 = sshll.u32 %s1523_s18, 4  ;;  %s1524_s1 = smov [#allocation2]   ;;  %s1132_s19 = int_to_ptr.vmem [resolvable:$true] %s1131_s19 }
   0x8   :  { %v1355_v34 = vpack.c.bf16 %v429_v33, %v428_v32  ;;  %v1359_v40 = vpack.c.bf16 %v431_v37, %v430_v36  ;;  %v520_v43 = vld [vmem:[%s1838_s2 + $0x38] sm:$0xff]  ;;  %v521_v44 = vld [vmem:[%s1838_s2 + $0x40] sm:$0xff]  ;;  %v1199_v46 = vld [vmem:[%s1838_s2 + $0x30] ss:$0 sm:$0xff]  ;;  %s1121_s20 = sshll.u32 %s1524_s1, 4  ;;  %s1413_s21 = scalar_lea.vmem %s1132_s19, 128  ;;  %s1122_s20 = int_to_ptr.vmem [resolvable:$true] %s1121_s20 }
   0x9   :  { %v1363_v45 = vpack.c.bf16 %v521_v44, %v520_v43  ;;  %v608_v53 = vld [vmem:[%s1838_s2 + $0x50] sm:$0xff]  ;;  %v609_v54 = vld [vmem:[%s1838_s2 + $0x58] sm:$0xff]  ;;  %v1202_v56 = vld [vmem:[%s1838_s2 + $0x48] ss:$0 sm:$0xff]  ;;  %p1414_p0 = scmp.ne.s32.totalorder %s1132_s19, %s1413_s21  ;;  %p1418_p1 = scmp.lt.s32.totalorder %s1132_s19, %s1132_s19 }
   0xa   :  { %v1368_v55 = vpack.c.bf16 %v609_v54, %v608_v53  ;;  %v705_v1 = vld [vmem:[%s1838_s2 + $0x68] sm:$0xff]  ;;  %v706_v3 = vld [vmem:[%s1838_s2 + $0x70] sm:$0xff]  ;;  %v707_v4 = vld [vmem:[%s1838_s2 + $0x78] sm:$0xff]  ;;  %p1419_p2 = scmp.lt.s32.totalorder %s1413_s21, %s1413_s21 }
   0xb   :  { %v790_v37 = vld [vmem:[%s1838_s2 + $0xa0] sm:$0xff] }
   0xc   :  { %1261 = vmatmul.mubr.msk.f32.vlgmr.msra.gmra.mrb[0].mxu0 %vm31_vm0, %v1603_v6  ;;  %p1420_p3 = por %p1419_p2, %p1418_p1 }
   0xd   :  { %1281 = vmatprep.mubr.msk.f32.mxu0 %vm1520_vm2, %v1521_v5  ;;  %1354 = vmatpush3.bf16.msra.mxu0 %v1349_v17 }
   0xe   :  { %1356 = vmatprep.subr.bf16.mxu0 %v1355_v34  ;;  %p1421_p4 = pnand %p1420_p3, %p1414_p0 }
  0xdf   :  { %v107_v7 = vpop.f32.mrb[0].mxu0 }
  0xe0   :  { %v1262_v8 = vpop.f32.mrb[1].mxu0  ;;  %v112_v9 = vsel %vm111_vm3, %v107_v7, -inf }
  0xe1   :  { %113 = vmax.xlane.f32.xlu0 %v112_v9  ;;  %v708_v8 = vld [vmem:[%s1838_s2 + $0x80] sm:$0xff] }
  0xe2   :  { %v1374_v9 = vpack.c.bf16 %v708_v8, %v707_v4 }
 0x16e   :  { %v114_v10 = vpop.xlane.xlu0 %113 }
 0x16f   :  { %v115_v11 = vsub.f32 %v107_v7, %v114_v10  ;;  %v1371_v7 = vpack.c.bf16 %v706_v3, %v705_v1 }
 0x171   :  { %v116_v12 = vmul.f32 1.442695, %v115_v11 }
 0x173   :  { %1397 = vpow2.f32 %v116_v12 }
 0x17d   :  { %v1398_v13 = vpop.eup %1397 }
 0x17e   :  { %v118_v14 = vsel %vm111_vm3, %v1398_v13, 0.0 }
 0x17f   :  { %119 = vadd.xlane.f32.xlu0 %v118_v14 }
 0x20c   :  { %v120_v18 = vpop.xlane.xlu0 %119 }
 0x20d   :  { %1399 = vrcp.f32 %v120_v18 }
 0x217   :  { %v1400_v19 = vpop.eup %1399 }
 0x218   :  { %v1617_v20 = vmul.f32 %v1400_v19, %v1398_v13  ;;  %v788_v19 = vld [vmem:[%s1838_s2 + $0x90] sm:$0xff] }
 0x21a   :  { %1268 = vmatmul.mubr.msk.f32.vlgmr.msra.gmra.mrb[0].mxu1 %vm111_vm3, %v1617_v20 }
 0x21b   :  { %1351 = vmatpush3.bf16.xpose.msk.msra.mxu1 %vm1587_vm1, %v1349_v17  ;;  %1274 = vmatprep.mubr.msk.f32.mxu1 %vm1520_vm2, %v1521_v5 }
 0x21c   :  { %1364 = vmatprep.subr.bf16.mxu1 %v1363_v45 }
 0x222   :  { %1275 = vmatmul.mubr.msk.f32.vlgmr.msra.gmra.mrb[2].mxu1 %vm31_vm0, %v1628_v21 }
 0x223   :  { %1366 = vmatpush3.bf16.msra.mxu1 %v1363_v45  ;;  %v978_v45 = vlaneseq }
 0x224   :  { %1367 = vmatprep.subr.bf16.mxu1 %v1519_v2 }
 0x2ed   :  { %v192_v22 = vpop.f32.mrb[0].mxu1 }
 0x2ee   :  { %v1269_v23 = vpop.f32.mrb[1].mxu1 }
 0x2f5   :  { %v271_v24 = vpop.f32.mrb[2].mxu1 }
 0x2f6   :  { %v1276_v25 = vpop.f32.mrb[3].mxu1  ;;  %v275_v26 = vsel %vm111_vm3, %v271_v24, -inf }
 0x2f7   :  { %276 = vmax.xlane.f32.xlu1 %v275_v26 }
 0x384   :  { %v277_v27 = vpop.xlane.xlu1 %276 }
 0x385   :  { %v278_v28 = vsub.f32 %v271_v24, %v277_v27 }
 0x387   :  { %v279_v29 = vmul.f32 1.442695, %v278_v28 }
 0x389   :  { %1401 = vpow2.f32 %v279_v29  ;;  %v1206_v29 = vld [vmem:[%s1838_s2 + $0x60] ss:$0 sm:$0xff] }
 0x393   :  { %v1402_v30 = vpop.eup %1401 }
 0x394   :  { %v281_v31 = vsel %vm111_vm3, %v1402_v30, 0.0 }
 0x395   :  { %282 = vadd.xlane.f32.xlu1 %v281_v31 }
 0x422   :  { %v283_v35 = vpop.xlane.xlu1 %282 }
 0x423   :  { %1403 = vrcp.f32 %v283_v35 }
 0x42d   :  { %v1404_v38 = vpop.eup %1403 }
 0x42e   :  { %v1646_v39 = vmul.f32 %v1404_v38, %v1402_v30  ;;  %v791_v38 = vld [vmem:[%s1838_s2 + $0xa8] sm:$0xff] }
 0x430   :  { %1282 = vmatmul.mubr.msk.f32.vlgmr.msra.gmra.mrb[2].mxu0 %vm111_vm3, %v1646_v39 }
 0x431   :  { %1292 = vmatprep.mubr.msk.f32.mxu0 %vm31_vm0, %v192_v22  ;;  %1358 = vmatpush3.bf16.msra.mxu0 %v1355_v34  ;;  %v789_v22 = vld [vmem:[%s1838_s2 + $0x98] sm:$0xff] }
 0x432   :  { %1360 = vmatprep.subr.bf16.mxu0 %v1359_v40  ;;  %v1377_v24 = vpack.c.bf16 %v789_v22, %v788_v19 }
 0x435   :  { %1362 = vmatpush3.bf16.msra.mxu0 %v1359_v40  ;;  %v1380_v40 = vpack.c.bf16 %v791_v38, %v790_v37 }
 0x436   :  { %1370 = vmatprep.subr.bf16.mxu0 %v1519_v2 }
 0x503   :  { %v355_v41 = vpop.f32.mrb[2].mxu0 }
 0x504   :  { %v1283_v42 = vpop.f32.mrb[3].mxu0  ;;  %1293 = vmatmul.mubr.msk.f32.vlgmr.msra.gmra.mrb[4].mxu0 %vm31_vm0, %v355_v41  ;;  %v1031_v41 = vmul.f32 %v1628_v21, %v1628_v21 }
 0x505   :  { %1317 = vmatprep.mubr.msk.f32.mxu0 %vm1520_vm2, %v1521_v5  ;;  %1372 = vmatpush3.bf16.msra.mxu0 %v1371_v7  ;;  %v1024_v42 = vmul.f32 %v1603_v6, %v1603_v6 }
 0x506   :  { %1373 = vmatprep.subr.bf16.mxu0 %v1519_v2  ;;  %v1032_v43 = vsel %vm31_vm0, %v1031_v41, 0.0 }
 0x507   :  { %v1025_v44 = vsel %vm31_vm0, %v1024_v42, 0.0 }
 0x509   :  { %1375 = vmatpush3.bf16.msra.mxu0 %v1374_v9 }
 0x50a   :  { %1331 = vmatprep.subr.mxu0 %v1521_v5 }
 0x5d7   :  { %v1294_v47 = vpop.f32.mrb[4].mxu0 }
 0x5d8   :  { %v515_v48 = vadd.f32 %v1294_v47, %v1199_v46  ;;  %v509_v49 = vpop.f32.mrb[5].mxu0  ;;  %v981_v47 = vand.u32 127, %v978_v45 }
 0x5d9   :  { %v510_v50 = vadd.f32 %v1199_v46, %v509_v49  ;;  %v979_v46 = vshrl.u32 %v978_v45, 7 }
 0x5da   :  { %v519_v52 = vmax.f32 %v515_v48, 0.0  ;;  %v1207_v48 = vld [vmem:[%s1838_s2 + $0x88] ss:$0 sm:$0xff] }
 0x5db   :  { %v518_v51 = vmax.f32 %v510_v50, 0.0  ;;  %vm982_vm5 = vcmp.eq.s32.totalorder %v979_v46, %v981_v47 }
 0x5dc   :  { %v1213_v49 = vsel %vm982_vm5, 1.0, %v1521_v5 }
 0x5dd   :  { %1299 = vmatprep.mubr.msk.f32.mxu1 %vm111_vm3, %v518_v51  ;;  %v1001_v53 = vsub.f32 1.0, %v1213_v49 }
 0x5de   :  { %1300 = vmatmul.mubr.msk.f32.vlgmr.msra.gmra.mrb[4].mxu1 %vm111_vm3, %v519_v52 }
 0x5df   :  { %1306 = vmatprep.mubr.msk.f32.mxu1 %vm1520_vm2, %v1521_v5  ;;  %1369 = vmatpush3.bf16.msra.mxu1 %v1368_v55 }
 0x5e0   :  { %1376 = vmatprep.subr.bf16.mxu1 %v1519_v2 }
 0x6b1   :  { %v1301_v57 = vpop.f32.mrb[4].mxu1 }
 0x6b2   :  { %v1679_v58 = vadd.f32 %v1301_v57, %v1202_v56  ;;  %v599_v59 = vpop.f32.mrb[5].mxu1 }
 0x6b3   :  { %v600_v60 = vadd.f32 %v1202_v56, %v599_v59 }
 0x6b4   :  { %871 = vst.msk [vmem:[#allocation5] sm:$0xff] %vm111_vm3, %v1679_v58  ;;  %v895_v61 = vmul.f32 %v1679_v58, %v1679_v58 }
 0x6b5   :  { %870 = vst.msk [vmem:[#allocation2] sm:$0xff] %vm111_vm3, %v600_v60  ;;  %1307 = vmatmul.mubr.msk.f32.vlgmr.msra.gmra.mrb[6].mxu1 %vm111_vm3, %v600_v60  ;;  %v888_v63 = vmul.f32 %v600_v60, %v600_v60 }
 0x6b6   :  { %v896_v62 = vsel %vm111_vm3, %v895_v61, 0.0  ;;  %1328 = vmatprep.mubr.msk.f32.mxu1 %vm1520_vm2, %v1521_v5  ;;  %1378 = vmatpush3.bf16.msra.mxu1 %v1377_v24 }
 0x6b7   :  { %897 = vadd.xlane.f32.xlu1 %v896_v62  ;;  %v889_v0 = vsel %vm111_vm3, %v888_v63, 0.0  ;;  %1379 = vmatprep.subr.bf16.mxu1 %v1519_v2 }
 0x6ba   :  { %1381 = vmatpush3.bf16.msra.mxu1 %v1380_v40 }
 0x6bb   :  { %890 = vadd.xlane.f32.xlu1 %v889_v0  ;;  %1336 = vmatprep.subr.mxu1 %v1521_v5 }
 0x6bf   :  { %1033 = vadd.xlane.f32.xlu1 %v1032_v43 }
 0x6c3   :  { %1026 = vadd.xlane.f32.xlu1 %v1025_v44 }
 0x744   :  { %v898_v25 = vpop.xlane.xlu1 %897 }
 0x745   :  { %v899_v26 = vmax.f32 %v898_v25, 1e-24 }
 0x747   :  { %1405 = vrsqrt.f32 %v899_v26 }
 0x748   :  { %v891_v27 = vpop.xlane.xlu1 %890 }
 0x749   :  { %v892_v28 = vmax.f32 %v891_v27, 1e-24 }
 0x74b   :  { %1407 = vrsqrt.f32 %v892_v28 }
 0x74c   :  { %v1034_v63 = vpop.xlane.xlu1 %1033 }
 0x74d   :  { %v1035_v0 = vmax.f32 %v1034_v63, 1e-24 }
 0x74f   :  { %1409 = vrsqrt.f32 %v1035_v0 }
 0x750   :  { %v1027_v1 = vpop.xlane.xlu1 %1026 }
 0x751   :  { %v1406_v32 = vpop.eup %1405  ;;  %v1028_v3 = vmax.f32 %v1027_v1, 1e-24 }
 0x752   :  { %v901_v36 = vmul.f32 %v1406_v32, %v1679_v58 }
 0x753   :  { %1411 = vrsqrt.f32 %v1028_v3 }
 0x755   :  { %v1408_v35 = vpop.eup %1407 }
 0x756   :  { %v894_v2 = vmul.f32 %v1408_v35, %v600_v60 }
 0x759   :  { %v1410_v4 = vpop.eup %1409 }
 0x75a   :  { %v1037_v7 = vmul.f32 %v1410_v4, %v1628_v21 }
 0x75d   :  { %v1412_v8 = vpop.eup %1411 }
 0x788   :  { %v679_v10 = vpop.f32.mrb[6].mxu1 }
 0x789   :  { %v684_v11 = vsel %vm683_vm4, %v679_v10, 0.0  ;;  %v1308_v12 = vpop.f32.mrb[7].mxu1 }
 0x78a   :  { %v685_v13 = vrot.slane %v684_v11, 4 }
 0x78c   :  { %v686_v14 = vadd.f32 %v685_v13, %v684_v11 }
 0x78e   :  { %v687_v15 = vrot.slane %v686_v14, 2 }
 0x790   :  { %v688_v16 = vadd.f32 %v687_v15, %v686_v14 }
 0x792   :  { %v689_v17 = vrot.slane %v688_v16, 1 }
 0x794   :  { %v690_v18 = vadd.f32 %v689_v17, %v688_v16 }
 0x796   :  { %v692_v23 = vmul.f32 0.125, %v690_v18 }
 0x798   :  { %694 = vrot.lane.b32.xlu0 %v692_v23, %s1522_s28 }
 0x80a   :  { %v695_v30 = vpop.permute.xlu0 %694 }
 0x80b   :  { %v697_v31 = vadd.f32 %v695_v30, %v679_v10 }
 0x80d   :  { %v703_v33 = vadd.f32 %v1206_v29, %v697_v31 }
 0x80f   :  { %v704_v34 = vmax.f32 %v703_v33, 0.0 }
 0x811   :  { %1318 = vmatmul.mubr.msk.f32.vlgmr.msra.gmra.mrb[6].mxu0 %vm31_vm0, %v704_v34 }
 0x812   :  { %1332 = vmatpush3.xpose.msk.msra.mxu0 %vm111_vm3, %v901_v36  ;;  %1333 = vmatprep.mubr.msk.f32.mxu0 %vm1520_vm2, %v1521_v5 }
 0x815   :  { %1334 = vmatmul.mubr.msk.f32.vlgmr.msra.gmra.mrb[8].mxu0 %vm111_vm3, %v894_v2 }
 0x8e4   :  { %v783_v50 = vpop.f32.mrb[6].mxu0 }
 0x8e5   :  { %v784_v51 = vadd.f32 %v1207_v48, %v783_v50  ;;  %v1319_v52 = vpop.f32.mrb[7].mxu0 }
 0x8e7   :  { %v787_v54 = vmax.f32 %v784_v51, 0.0 }
 0x8e8   :  { %v974_v55 = vpop.f32.mrb[8].mxu0 }
 0x8e9   :  { %v1002_v56 = vmul.f32 %v1001_v53, %v974_v55  ;;  %1329 = vmatmul.mubr.msk.f32.vlgmr.msra.gmra.mrb[8].mxu1 %vm31_vm0, %v787_v54  ;;  %v1335_v57 = vpop.f32.mrb[9].mxu0  ;;  %v985_v9 = vmul.f32 %v1213_v49, %v974_v55 }
 0x8ea   :  { %1338 = vmatprep.mubr.msk.f32.mxu1 %vm1520_vm2, %v1521_v5  ;;  %1337 = vmatpush3.xpose.msk.msra.mxu1 %vm31_vm0, %v1037_v7  ;;  %v1030_v5 = vmul.f32 %v1412_v8, %v1603_v6 }
 0x8eb   :  { %v1214_v59 = vadd.f32 -0.5, %v1002_v56  ;;  %v986_v21 = vsub.f32 %v985_v9, %v1213_v49 }
 0x8ed   :  { %v1004_v60 = vmax.f32 %v1214_v59, 0.0  ;;  %1339 = vmatmul.mubr.msk.f32.vlgmr.msra.gmra.mrb[10].mxu1 %vm31_vm0, %v1030_v5  ;;  %v987_v16 = vmul.f32 %v986_v21, %v986_v21 }
 0x8ef   :  { %v1005_v61 = vmul.f32 %v1004_v60, %v1001_v53  ;;  %v988_v6 = vsel %vm391_vm6, %v987_v16, 0.0 }
 0x8f1   :  { %v1006_v62 = vsel %vm391_vm6, %v1005_v61, 0.0 }
 0x8f2   :  { %1007 = vadd.xlane.f32.xlu0 %v1006_v62 }
 0x91f   :  { %394 = vxpose.xlu0.b32.start.end [1/1] (short) (narrow) %v1646_v39, 16  ;;  %v1209_v39 = vld [vmem:[%s1838_s2 + $0xb0] ss:$0 sm:$0xff] }
 0x97f   :  { %v1755_v17 = vpop.xlane.xlu0 %1007 }
 0x99f   :  { %v410_v18 = vpop.trf.xlu0 }
 0x9a0   :  { %426 = vst.msk [vmem:[%s1844_s8] sm:$0xff] %vm391_vm6, %v410_v18 }
 0x9bc   :  { %v866_v10 = vpop.f32.mrb[8].mxu1 }
 0x9bd   :  { %v867_v11 = vadd.f32 %v1209_v39, %v866_v10  ;;  %v1330_v12 = vpop.f32.mrb[9].mxu1 }
 0x9bf   :  { %v873_v13 = vsub.f32 %v867_v11, %v1679_v58  ;;  %872 = vst.msk [vmem:[#allocation7] sm:$0xff] %vm111_vm3, %v867_v11 }
 0x9c0   :  { %v1110_v58 = vpop.f32.mrb[10].mxu1 }
 0x9c1   :  { %v874_v14 = vmul.f32 %v873_v13, %v873_v13  ;;  %1114 = vst.msk [vmem:[#allocation8] sm:$0xff] %vm391_vm6, %v1110_v58  ;;  %v1340_v19 = vpop.f32.mrb[11].mxu1 }
 0x9c3   :  { %v875_v15 = vsel %vm111_vm3, %v874_v14, 0.0 }
 0x9c4   :  { %876 = vadd.xlane.f32.xlu1 %v875_v15 }
 0x9c8   :  { %989 = vadd.xlane.f32.xlu1 %v988_v6 }
 0x9fb   :  { %359 = vxpose.xlu1.b32.start.end [1/1] (short) (narrow) %v1617_v20, 16 }
 0x9fc   :  { %1424 = shalt.err (!%p1421_p4)
}
 0x9fd   :  { %s1425_s24 = scalar_lea.hbm %s1840_s4, 128 }
 0x9fe   :  { %p1426_p5 = scmp.ne.s32.totalorder %s1840_s4, %s1425_s24  ;;  %p1429_p6 = scmp.lt.u32.totalorder %s1425_s24, %s1840_s4 }
 0xa00   :  { %p1431_p7 = pnand %p1429_p6, %p1426_p5 }
 0xa02   :  { %1434 = shalt.err (!%p1431_p7)
}
 0xa03   :  { %1134 = dma.vmem_to_hbm [thread:$0]  %s1132_s19, 128, %s1840_s4, [#allocation6]   ;;  %v411_v20 = vpop.trf.xlu0 }
 0xa04   :  { %427 = vst.msk [vmem:[%s1844_s8 + $0x8] sm:$0xff] %vm391_vm6, %v411_v20  ;;  %s1435_s12 = scalar_lea.vmem %s1122_s20, 128  ;;  %p1440_p9 = scmp.lt.s32.totalorder %s1122_s20, %s1122_s20 }
 0xa05   :  { %p1436_p8 = scmp.ne.s32.totalorder %s1122_s20, %s1435_s12  ;;  %p1441_p10 = scmp.lt.s32.totalorder %s1435_s12, %s1435_s12 }
 0xa07   :  { %p1442_p11 = por %p1441_p10, %p1440_p9 }
 0xa09   :  { %p1443_p12 = pnand %p1442_p11, %p1436_p8 }
 0xa0b   :  { %1446 = shalt.err (!%p1443_p12)
}
 0xa0c   :  { %s1447_s14 = scalar_lea.hbm %s1839_s3, 128 }
 0xa0d   :  { %p1448_p13 = scmp.ne.s32.totalorder %s1839_s3, %s1447_s14  ;;  %p1451_p0 = scmp.lt.u32.totalorder %s1447_s14, %s1839_s3 }
 0xa0f   :  { %p1453_p1 = pnand %p1451_p0, %p1448_p13 }
 0xa11   :  { %1456 = shalt.err (!%p1453_p1)
}
 0xa12   :  { %1124 = dma.vmem_to_hbm [thread:$0]  %s1122_s20, 128, %s1839_s3, [#allocation3]  }
 0xa13   :  { %s1525_s18 = smov [#allocation7]   ;;  %s1526_s1 = smov [#allocation8]  }
 0xa14   :  { %s1141_s19 = sshll.u32 %s1525_s18, 4  ;;  %s1151_s21 = sshll.u32 %s1526_s1, 4  ;;  %s1142_s19 = int_to_ptr.vmem [resolvable:$true] %s1141_s19  ;;  %s1152_s21 = int_to_ptr.vmem [resolvable:$true] %s1151_s21 }
 0xa15   :  { %s1457_s22 = scalar_lea.vmem %s1142_s19, 128  ;;  %p1462_p3 = scmp.lt.s32.totalorder %s1142_s19, %s1142_s19 }
 0xa16   :  { %p1458_p2 = scmp.ne.s32.totalorder %s1142_s19, %s1457_s22  ;;  %p1463_p4 = scmp.lt.s32.totalorder %s1457_s22, %s1457_s22 }
 0xa18   :  { %p1464_p5 = por %p1463_p4, %p1462_p3 }
 0xa1a   :  { %p1465_p6 = pnand %p1464_p5, %p1458_p2 }
 0xa1c   :  { %1468 = shalt.err (!%p1465_p6)
}
 0xa1d   :  { %s1469_s25 = scalar_lea.hbm %s1841_s5, 128 }
 0xa1e   :  { %p1470_p7 = scmp.ne.s32.totalorder %s1841_s5, %s1469_s25  ;;  %p1473_p8 = scmp.lt.u32.totalorder %s1469_s25, %s1841_s5 }
 0xa20   :  { %p1475_p9 = pnand %p1473_p8, %p1470_p7 }
 0xa22   :  { %1478 = shalt.err (!%p1475_p9)
}
 0xa23   :  { %1144 = dma.vmem_to_hbm [thread:$0]  %s1142_s19, 128, %s1841_s5, [#allocation6]  }
 0xa24   :  { %s1479_s30 = scalar_lea.vmem %s1152_s21, 128  ;;  %p1484_p11 = scmp.lt.s32.totalorder %s1152_s21, %s1152_s21 }
 0xa25   :  { %p1480_p10 = scmp.ne.s32.totalorder %s1152_s21, %s1479_s30  ;;  %p1485_p12 = scmp.lt.s32.totalorder %s1479_s30, %s1479_s30 }
 0xa27   :  { %p1486_p13 = por %p1485_p12, %p1484_p11 }
 0xa29   :  { %p1487_p0 = pnand %p1486_p13, %p1480_p10 }
 0xa2b   :  { %1490 = shalt.err (!%p1487_p0)
}
 0xa2c   :  { %s1491_s12 = scalar_lea.hbm %s1842_s6, 128 }
 0xa2d   :  { %p1492_p1 = scmp.ne.s32.totalorder %s1842_s6, %s1491_s12  ;;  %p1495_p2 = scmp.lt.u32.totalorder %s1491_s12, %s1842_s6 }
 0xa2f   :  { %p1497_p3 = pnand %p1495_p2, %p1492_p1 }
 0xa31   :  { %1500 = shalt.err (!%p1497_p3)
}
 0xa32   :  { %1154 = dma.vmem_to_hbm [thread:$0]  %s1152_s21, 128, %s1842_s6, [#allocation9]   ;;  %v1009_v22 = vrot.slane %v1755_v17, 4 }
 0xa33   :  { %s1501_s26 = scalar_lea.hbm %s1845_s9, 16 }
 0xa34   :  { %v1010_v23 = vadd.f32 %v1009_v22, %v1755_v17  ;;  %p1502_p4 = scmp.ne.s32.totalorder %s1845_s9, %s1501_s26  ;;  %p1505_p5 = scmp.lt.u32.totalorder %s1501_s26, %s1845_s9 }
 0xa36   :  { %v1011_v27 = vrot.slane %v1010_v23, 2  ;;  %p1507_p6 = pnand %p1505_p5, %p1502_p4 }
 0xa38   :  { %v1012_v33 = vadd.f32 %v1011_v27, %v1010_v23 }
 0xa3a   :  { %v1013_v37 = vrot.slane %v1012_v33, 1 }
 0xa3c   :  { %v1014_v41 = vadd.f32 %v1013_v37, %v1012_v33 }
 0xa51   :  { %v877_v24 = vpop.xlane.xlu1 %876 }
 0xa52   :  { %v878_v25 = vrot.slane %v877_v24, 4 }
 0xa54   :  { %v879_v26 = vadd.f32 %v878_v25, %v877_v24 }
 0xa55   :  { %v990_v28 = vpop.xlane.xlu1 %989 }
 0xa56   :  { %v880_v29 = vrot.slane %v879_v26, 2  ;;  %v991_v30 = vrot.slane %v990_v28, 4 }
 0xa58   :  { %v992_v31 = vadd.f32 %v991_v30, %v990_v28  ;;  %v881_v32 = vadd.f32 %v880_v29, %v879_v26 }
 0xa5a   :  { %v993_v34 = vrot.slane %v992_v31, 2  ;;  %v882_v35 = vrot.slane %v881_v32, 1 }
 0xa5c   :  { %v883_v36 = vadd.f32 %v882_v35, %v881_v32  ;;  %v994_v2 = vadd.f32 %v993_v34, %v992_v31 }
 0xa5e   :  { %1382 = vpush %v883_v36  ;;  %v995_v38 = vrot.slane %v994_v2, 1 }
 0xa60   :  { %v996_v40 = vadd.f32 %v995_v38, %v994_v2 }
 0xa62   :  { %1384 = vpush %v996_v40 }
 0xa63   :  { %1386 = vpush %v1014_v41 }
 0xa7b   :  { %v375_v42 = vpop.trf.xlu1 }
 0xa7c   :  { %392 = vst.msk [vmem:[%s1843_s7] sm:$0xff] %vm391_vm6, %v375_v42 }
 0xa7f   :  { %v376_v43 = vpop.trf.xlu1 }
 0xa80   :  { %393 = vst.msk [vmem:[%s1843_s7 + $0x8] sm:$0xff] %vm391_vm6, %v376_v43 }
 0xa8f   :  { %s1383_s17 = spop %1382 }
 0xa90   :  { %s887_s18 = smul.f32 0.0078125, %s1383_s17 }
 0xa92   :  { %1023 = sst [smem:[#allocation10 + $0x1]] %s887_s18 }
 0xa93   :  { %s1385_s19 = spop %1384 }
 0xa94   :  { %s1000_s1 = smul.f32 0.015625, %s1385_s19  ;;  %s1387_s21 = spop %1386 }
 0xa95   :  { %s1018_s22 = smul.f32 0.015625, %s1387_s21 }
 0xa97   :  { %s1019_s23 = sadd.f32 %s1018_s22, %s1000_s1 }
 0xa99   :  { %1021 = sst [smem:[#allocation10]] %s1019_s23 }
 0xa9a   :  { %1510 = shalt.err (!%p1507_p6)
}
 0xa9b   :  { %s1527_s7 = smov [#allocation10]  }
 0xa9c   :  { %1166 = dma.smem_to_hbm %s1527_s7, 16, %s1845_s9, [#allocation4]  }
 0xa9d   :  { %1511 = dma.done.wait [#allocation3], 128  }
 0xa9e   :  { %1512 = vsyncadd [#allocation3], 4294967168 }
 0xa9f   :  { %1513 = dma.done.wait [#allocation6], 256  }
 0xaa0   :  { %1514 = vsyncadd [#allocation6], 4294967040 }
 0xaa1   :  { %1515 = dma.done.wait [#allocation9], 128  }
 0xaa2   :  { %1516 = vsyncadd [#allocation9], 4294967168 }
 0xaa3   :  { %1517 = dma.done.wait [#allocation4], 16  }
 0xaa4   :  { %1518 = vsyncadd [#allocation4], 4294967280 }
 0xaa5   :  { %1186 = sfence }
 0xaa6   :  { %1187 = vsyncpa [#allocation3], 1 }
 0xaa7   :  { %1188 = vsyncpa [#allocation6], 1 }
 0xaa8   :  { %1189 = vsyncpa [#allocation9], 1 }
 0xaa9   :  { %1190 = vsyncpa [#allocation4], 1 }

</bundles_post_ra>
